<compile_context>
chip_gen: v6e
topology: v6e:2x2x1
jax: 0.10.0
libtpu: 0.0.40
codegen_flags: <defaults>
</compile_context>

<pallas_src>
import functools

import jax
import jax.numpy as jnp
from jax.experimental import pallas as pl
from jax.experimental.pallas import tpu as pltpu


def _as_pair(v):
    return list(v) if isinstance(v, (list, tuple)) else [v, v]


def _pick_nc_tile(nc, slice_bytes, target_bytes=4 * 1024 * 1024):
    """Largest divisor of `nc` whose input block stays under `target_bytes`,
    while keeping at least two grid steps (megacore / v7x dual-TensorCore)."""
    tc = max(1, min(nc, target_bytes // max(slice_bytes, 1)))
    if nc >= 2:
        tc = min(tc, max(1, (nc + 1) // 2))
    while nc % tc:
        tc -= 1
    return tc


def _crop_lanes_kernel(x_ref, o_ref, *, start):
    # x_ref: (tc, 1, H*W), o_ref: (tc, 1, out_h*W).  pad_w == 0, so the crop is
    # a single contiguous slice along the flattened (lane-dense) H*W axis and
    # the store covers the full output block width.
    out_len = o_ref.shape[-1]
    o_ref[...] = x_ref[:, :, start:start + out_len]


def _crop_hw_kernel(x_ref, o_ref, *, pad_top, pad_left):
    # x_ref: (tc, H, W), o_ref: (tc, out_h, out_w).  General H/W crop; the
    # output block spans the full output array in its last two dims.
    _, out_h, out_w = o_ref.shape
    o_ref[...] = x_ref[:, pad_top:pad_top + out_h, pad_left:pad_left + out_w]


def conv_transpose2d_same_pad(x, kernel_size, stride):
    """JAX/Pallas equivalent of ConvTranspose2dSamePad.forward (NCHW)."""
    ks = _as_pair(kernel_size)
    st = _as_pair(stride)
    if ks[0] < st[0] or ks[1] < st[1]:
        raise ValueError(
            "ConvTranspose2dSamePad requires kernel_size >= stride per axis, "
            f"got kernel_size={ks}, stride={st}")

    n, c, in_h, in_w = x.shape
    pad_h = ks[0] - st[0]
    pad_w = ks[1] - st[1]
    pad_top = pad_h // 2
    pad_left = pad_w // 2
    out_h = in_h - pad_h
    out_w = in_w - pad_w

    if pad_h == 0 and pad_w == 0:
        # No-op crop: don't burn a full HBM read + write on an identity copy.
        return x

    nc = n * c
    slice_bytes = in_h * in_w * x.dtype.itemsize
    tc = _pick_nc_tile(nc, slice_bytes)
    grid = (nc // tc,)
    cparams = pltpu.CompilerParams(dimension_semantics=("parallel",))

    if pad_w == 0:
        # Lane-dense fast path: the crop is one contiguous slice of the
        # flattened H*W axis; output last dim is out_h*W (large, full-width).
        hw = in_h * in_w
        out_hw = out_h * in_w
        x_flat = x.reshape(nc, 1, hw)
        kernel = functools.partial(_crop_lanes_kernel, start=pad_top * in_w)
        out = pl.pallas_call(
            kernel,
            out_shape=jax.ShapeDtypeStruct((nc, 1, out_hw), x.dtype),
            grid=grid,
            in_specs=[pl.BlockSpec((tc, 1, hw), lambda i: (i, 0, 0))],
            out_specs=pl.BlockSpec((tc, 1, out_hw), lambda i: (i, 0, 0)),
            compiler_params=cparams,
        )(x_flat)
        return out.reshape(n, c, out_h, out_w)

    # General path: crop in W (and possibly H). Blocks keep full H/W so the
    # (8, 128) tiling constraint is always met for any tc.
    x3 = x.reshape(nc, in_h, in_w)
    kernel = functools.partial(_crop_hw_kernel, pad_top=pad_top, pad_left=pad_left)
    out = pl.pallas_call(
        kernel,
        out_shape=jax.ShapeDtypeStruct((nc, out_h, out_w), x.dtype),
        grid=grid,
        in_specs=[pl.BlockSpec((tc, in_h, in_w), lambda i: (i, 0, 0))],
        out_specs=pl.BlockSpec((tc, out_h, out_w), lambda i: (i, 0, 0)),
        compiler_params=cparams,
    )(x3)
    return out.reshape(n, c, out_h, out_w)


if __name__ == "__main__":
    key = jax.random.PRNGKey(0)
    x = jax.random.normal(key, (2, 4, 16, 16), dtype=jnp.float32)  # NCHW

    def ref_crop(x, kernel_size, stride):
        ks = _as_pair(kernel_size)
        st = _as_pair(stride)
        ph, pw = ks[0] - st[0], ks[1] - st[1]
        pt, pleft = ph // 2, pw // 2
        pb, pr = ph - pt, pw - pleft
        H, W = x.shape[2], x.shape[3]
        return x[:, :, pt:H - pb, pleft:W - pr]

    cases = [
        (3, 2),        # pad_h = pad_w = 1  -> general H/W crop path
        (5, 2),        # pad_h = pad_w = 3  -> general path, nonzero pad_top/left
        ((3, 2), 2),   # pad_h = 1, pad_w = 0 -> lane-dense flattened path
        ((5, 2), 2),   # pad_h = 3, pad_w = 0 -> lane-dense path, offset start
        (2, 2),        # pad = 0            -> no-op early return
    ]
    for ks, st in cases:
        out = jax.block_until_ready(conv_transpose2d_same_pad(x, ks, st))
        ref = ref_crop(x, ks, st)
        assert out.shape == ref.shape, (ks, st, out.shape, ref.shape)
        assert jnp.array_equal(out, ref), (ks, st)

    print("KERNEL_OK")
</pallas_src>

<mosaic_0001>
module attributes {stable_mosaic.version = 11 : i64} {
  func.func @_crop_hw_kernel(%arg0: i32, %arg1: memref<4x16x16xf32, #tpu.memory_space<vmem>>, %arg2: memref<4x15x15xf32, #tpu.memory_space<vmem>>) attributes {dimension_semantics = [#tpu.dimension_semantics<parallel>], iteration_bounds = array<i64: 2>, scalar_prefetch = 0 : i64, scratch_operands = 0 : i64, tpu.core_type = #tpu.core_type<tc>, window_params = [{transform_indices = @transform_0, window_bounds = array<i64: 4, 16, 16>}, {transform_indices = @transform_1, window_bounds = array<i64: 4, 15, 15>}]} {
    %c0 = arith.constant 0 : index
    %c0_0 = arith.constant 0 : index
    %c0_1 = arith.constant 0 : index
    %0 = vector.load %arg1[%c0, %c0_0, %c0_1] : memref<4x16x16xf32, #tpu.memory_space<vmem>>, vector<4x15x15xf32>
    %c0_2 = arith.constant 0 : index
    %c0_3 = arith.constant 0 : index
    %c0_4 = arith.constant 0 : index
    %1 = vector.load %arg2[%c0_2, %c0_3, %c0_4] : memref<4x15x15xf32, #tpu.memory_space<vmem>>, vector<4x15x15xf32>
    tpu.vector_store %arg2[%c0_2, %c0_3, %c0_4], %0 {strides = array<i32>} : memref<4x15x15xf32, #tpu.memory_space<vmem>>, vector<4x15x15xf32>,
    return
  }
  func.func @transform_0(%arg0: i32) -> (i32, i32, i32) {
    %c0_i32 = arith.constant 0 : i32
    %c0_i32_0 = arith.constant 0 : i32
    %c0_i32_1 = arith.constant 0 : i32
    return %arg0, %c0_i32, %c0_i32_0 : i32, i32, i32
  }
  func.func @transform_1(%arg0: i32) -> (i32, i32, i32) {
    %c0_i32 = arith.constant 0 : i32
    %c0_i32_0 = arith.constant 0 : i32
    %c0_i32_1 = arith.constant 0 : i32
    return %arg0, %c0_i32, %c0_i32_0 : i32, i32, i32
  }
}

</mosaic_0001>

<bundles_post_ra>
// kernel: tpu_custom_call.1
= control target key start
LH: loop header
LB: loop body
LE: loop exit
PB: predicated region body
PF: predicated region fallthrough
CT: control target
= control target key end

     0   :  { %6 = vsyncpa [#allocation3], 0  ;;  %s473_s0 = inlined_call_operand.hbm [shape: f32[8,16,16], index: 0, kind: input, shape index: {}]   ;;  %s474_s1 = inlined_call_operand.vmem [shape: f32[8,15,15], index: 1, kind: output, shape index: {}]  }
   0x1   :  { %8 = vsyncpa [#allocation3 + $0x1], 0  ;;  %s365_s6 = smov 0   ;;  %s367_s7 = smov 0  }
   0x2   :  { %s369_s8 = smov 0   ;;  %s371_s9 = smov 0  }
   0x3 LB: > { %s229_s10 = sadd.s32 4294967295, %s350_s9   ;;  %s385_s11 = sadd.s32 1, %s350_s9   ;;  %s350_s9 = sphi %s371_s9, %s483_s9   ;;  %s346_s8 = sphi %s369_s8, %s482_s8   ;;  %s342_s7 = sphi %s367_s7, %s481_s7   ;;  %s338_s6 = sphi %s365_s6, %s480_s6  }
   0x4   : > { %s18_s12 = ssub.s32 %s350_s9, %s385_s11  ;;  %s21_s13 = sadd.s32 1, %s346_s8 }
   0x5   : > { %p19_p0 = scmp.eq.s32.totalorder %s18_s12, 0  ;;  %p28_p1 = scmp.ne.s32.totalorder %s346_s8, %s342_s7 }
   0x6   : > { %p29_p2 = scmp.eq.s32.totalorder %s350_s9, 0  ;;  %p34_p3 = scmp.ne.s32.totalorder %s342_s7, %s338_s6 }
   0x7   : > { %s395_s14 = scalar_select %p19_p0, %s346_s8, %s21_s13  }
   0x8   : > { %p30_p4 = por %p29_p2, %p28_p1  ;;  %p35_p5 = scmp.eq.s32.totalorder %s229_s10, 0 }
   0x9   : > { %p253_p6 = scmp.lt.s32.totalorder %s350_s9, 2  ;;  %s84_s16 = sand.u32 1, %s346_s8  }
   0xa   : > { %p400_p7 = por %p35_p5, %p34_p3  ;;  %s233_s17 = sshll.u32 %s84_s16, 6 }
   0xb   : > { %s245_s18 = sshll.u32 %s350_s9, 10  ;;  %s88_s22 = scalar_lea.vmem [#allocation2], %s233_s17 }
   0xc   : > { %s476_s15 = scalar_select %p400_p7, 1, 0 }
   0xd   : > { %s409_s21 = scalar_lea.hbm %s473_s0, %s245_s18  ;;  %s96_s23 = sshll.u32 %s88_s22, 4  ;;  %s411_s23 = int_to_ptr.vmem [resolvable:$true] %s96_s23 }
   0xe   : > { %p413_p8 = pnand %p253_p6, %p30_p4  ;;  %s418_s25 = scalar_lea.sflag [#allocation3], %s84_s16 }
   0xf   : > { %s288_s26 = scalar_lea.hbm %s409_s21, 1024  ;;  %s293_s29 = scalar_lea.hbm %s473_s0, 2048 }
  0x10   : > { %p289_p10 = scmp.ne.s32.totalorder %s409_s21, %s288_s26  ;;  %p290_p11 = pneg %p413_p8 }
  0x11   : > { %p294_p0 = scmp.lt.s32.totalorder %s409_s21, %s473_s0  ;;  %p295_p1 = scmp.lt.s32.totalorder %s293_s29, %s288_s26 }
  0x12   : > { %p291_p12 = pnand %p290_p11, %p289_p10 }
  0x13   : > { %p296_p2 = por %p295_p1, %p294_p0 }
  0x14   : > { %p292_p13 = pneg %p291_p12 }
  0x16   : > { %p297_p3 = pnand %p296_p2, %p292_p13 }
  0x18   : > { %300 = shalt.err (!%p297_p3)
}
  0x19   : > { %s301_s3 = scalar_lea.vmem %s411_s23, 1024  ;;  %s352_s4 = smov [#allocation2]  }
  0x1a   : > { %p302_p4 = scmp.ne.s32.totalorder %s411_s23, %s301_s3  ;;  %s306_s5 = sshll.u32 %s352_s4, 4  ;;  %s307_s5 = int_to_ptr.vmem [resolvable:$false] %s306_s5 }
  0x1b   : > { %s308_s6 = scalar_lea.vmem %s307_s5, 2048  ;;  %p309_p10 = scmp.lt.s32.totalorder %s411_s23, %s307_s5 }
  0x1c   : > { %p304_p5 = pnand %p302_p4, %p290_p11  ;;  %p310_p12 = scmp.lt.s32.totalorder %s308_s6, %s301_s3 }
  0x1e   : > { %p305_p6 = pneg %p304_p5  ;;  %p311_p9 = por %p310_p12, %p309_p10 }
  0x20   : > { %p312_p7 = pnand %p311_p9, %p305_p6 }
  0x22   : > { %315 = shalt.err (!%p312_p7)
}
  0x23   : > { %s353_s12 = smov 128   ;;  %s354_s13 = smov 8  }
  0x24   : > { %252 = dma.hbm_to_vmem [thread:$0]  (!%p413_p8), %s409_s21, 1024, %s411_s23, %s418_s25, %s353_s12, %s353_s12, %s354_s13  }
  0x25   : > { %p104_p11 = scmp.lt.s32.totalorder %s350_s9, 3  ;;  %p478_p13 = scmp.ge.s32.totalorder %s350_s9, 1 }
  0x27   : > { %p105_p0 = pnand %p478_p13, %p104_p11 }
  0x28   : > { %s110_s16 = sand.u32 (!%p105_p0), 1, %s342_s7   ;;  %p479_p7 = scmp.ne.s32.totalorder (!%p105_p0), %s476_s15, 0 }
  0x29   : > { %108 = sbr.rel (%p105_p0) target bundleno = 57 (0x39), region = 24  ;;  %s238_s17 = sshll.u32 (!%p105_p0), %s110_s16, 6 }
  0x2a   : > { %s111_s18 = scalar_lea.sflag (!%p105_p0), [#allocation3], %s110_s16  ;;  %s114_s19 = scalar_lea.vmem (!%p105_p0), [#allocation2], %s238_s17 }
  0x2e   : > { %333 = dma.done.wait (%p479_p7), %s111_s18, 1024  }
  0x2f   : > { %335 = vsyncadd (%p479_p7), %s111_s18, 4294966272  ;;  %s239_s20 = sshll.u32 %s229_s10, 2  ;;  %vm150_vm0 = vcmask 121856   ;;  %vm152_vm1 = vcmask 120832   ;;  %v142_v0 = vld [vmem:[%s114_s19] sm:$0xff]  ;;  %v144_v2 = vld [vmem:[%s114_s19 + $0x10] sm:$0xff] }
  0x30   : > { %p136_p9 = scmp.lt.s32.totalorder %s239_s20, 7  ;;  %v143_v1 = vld [vmem:[%s114_s19 + $0x8] sm:$0x7f]  ;;  %v145_v3 = vld [vmem:[%s114_s19 + $0x18] sm:$0x7f]  ;;  %v146_v4 = vld [vmem:[%s114_s19 + $0x20] sm:$0xff] }
  0x31   : > { %v147_v5 = vld [vmem:[%s114_s19 + $0x28] sm:$0x7f]  ;;  %v148_v6 = vld [vmem:[%s114_s19 + $0x30] sm:$0xff]  ;;  %v149_v7 = vld [vmem:[%s114_s19 + $0x38] sm:$0x7f] }
  0x32   : > { %s485_s20 = smov (!%p136_p9, %s239_s20), 7 }
  0x33   : > { %s246_s21 = sshll.u32 %s485_s20, 4 }
  0x34   : > { %s140_s24 = scalar_lea.vmem %s474_s1, %s246_s21 }
  0x35   : > { %151 = vst.msk [vmem:[%s140_s24] sm:$0xff] %vm150_vm0, %v142_v0  ;;  %154 = vst.msk [vmem:[%s140_s24 + $0x10] sm:$0xff] %vm150_vm0, %v144_v2 }
  0x36   : > { %153 = vst.msk [vmem:[%s140_s24 + $0x8] sm:$0x7f] %vm152_vm1, %v143_v1  ;;  %155 = vst.msk [vmem:[%s140_s24 + $0x18] sm:$0x7f] %vm152_vm1, %v145_v3 }
  0x37   : > { %156 = vst.msk [vmem:[%s140_s24 + $0x20] sm:$0xff] %vm150_vm0, %v146_v4  ;;  %158 = vst.msk [vmem:[%s140_s24 + $0x30] sm:$0xff] %vm150_vm0, %v148_v6 }
  0x38   : > { %157 = vst.msk [vmem:[%s140_s24 + $0x28] sm:$0x7f] %vm152_vm1, %v147_v5  ;;  %159 = vst.msk [vmem:[%s140_s24 + $0x38] sm:$0x7f] %vm152_vm1, %v149_v7 }
  0x39 PF: > { %p11_p8 = scmp.ge.s32.totalorder %s385_s11, 4   ;;  %s480_s6 = smov %s342_s7 }
  0x3a   : > { %s481_s7 = smov %s346_s8  ;;  %s482_s8 = smov %s395_s14 }
  0x3b   : > { %s483_s9 = smov %s385_s11  ;;  %13 = sbr.rel (!%p11_p8) target bundleno = 3 (0x3), region = 64 }
  0x40   :  { %184 = vsyncpa [#allocation3], 1 }
  0x41   :  { %186 = vsyncpa [#allocation3 + $0x1], 1 }

</bundles_post_ra>
